<compile_context>
chip_gen: v5e
topology: v5e:2x2
jax: 0.10.0
libtpu: 0.0.40
codegen_flags: <defaults>
</compile_context>

<pallas_src>
import numpy as np
import jax
import jax.numpy as jnp
from jax.experimental import pallas as pl
from jax.experimental.pallas import tpu as pltpu

EDGE_TILE = 512    # relation-grouped edges per tile for the score matmul kernel
SWEEP_TILE = 256   # dst-sorted edges per tile for the segmented softmax sweeps
NODE_TILE = 128    # destination nodes per softmax accumulator block


# --------------------------------------------------------------------------
# kernel 1: relation-grouped per-edge attention scores
# --------------------------------------------------------------------------
def score_kernel(tile_rel_ref, src_ref, dst_ref, w_ref, rel_ref, score_ref):
    """score_e = (W_r^T h_src)_e . tanh((W_r^T h_dst)_e + r_embed)."""
    r = tile_rel_ref[pl.program_id(0)]              # this tile's relation id (SMEM)
    w = w_ref[r]                                    # (D_r, D_e) bf16, VMEM-resident
    # contract D_e with D_e ("A @ B^T") -> (D_r, EDGE_TILE); edges on the lane axis
    dims = (((1,), (1,)), ((), ()))
    t_proj = jax.lax.dot_general(w, src_ref[0], dims,
                                 preferred_element_type=jnp.float32)
    h_proj = jax.lax.dot_general(w, dst_ref[0], dims,
                                 preferred_element_type=jnp.float32)
    act = jnp.tanh(h_proj + rel_ref[r])             # + relation embedding column (f32)
    score_ref[0] = jnp.sum(t_proj * act, axis=0, keepdims=True)   # (1, EDGE_TILE)


# --------------------------------------------------------------------------
# kernel 2a: per-destination-node max over its (dst-sorted, contiguous) edges
# --------------------------------------------------------------------------
def seg_max_kernel(visit_ref, span_ref, dst_ref, score_ref, m_ref):
    del visit_ref  # only consumed by the index_maps
    n = pl.program_id(0)
    e = pl.program_id(1)

    @pl.when(e == 0)
    def _():
        m_ref[...] = jnp.full(m_ref.shape, -jnp.inf, dtype=m_ref.dtype)

    @pl.when(e < span_ref[n])                       # skip clamped re-visits
    def _():
        node_ids = (n * NODE_TILE
                    + jax.lax.broadcasted_iota(jnp.int32, (NODE_TILE, 1), 0))
        member = dst_ref[0] == node_ids             # (NODE_TILE, SWEEP_TILE)
        masked = jnp.where(member, score_ref[0], -jnp.inf)
        m_ref[0] = jnp.maximum(m_ref[0], jnp.max(masked, axis=1, keepdims=True))


# --------------------------------------------------------------------------
# kernel 2b: per-destination-node sum of exp(score - max) (exp done once per
#            edge in XLA before this kernel)
# --------------------------------------------------------------------------
def seg_sum_kernel(visit_ref, span_ref, dst_ref, p_ref, l_ref):
    del visit_ref
    n = pl.program_id(0)
    e = pl.program_id(1)

    @pl.when(e == 0)
    def _():
        l_ref[...] = jnp.zeros(l_ref.shape, dtype=l_ref.dtype)

    @pl.when(e < span_ref[n])
    def _():
        node_ids = (n * NODE_TILE
                    + jax.lax.broadcasted_iota(jnp.int32, (NODE_TILE, 1), 0))
        member = dst_ref[0] == node_ids             # (NODE_TILE, SWEEP_TILE)
        contrib = jnp.where(member, p_ref[0], 0.0)
        l_ref[0] = l_ref[0] + jnp.sum(contrib, axis=1, keepdims=True)


# --------------------------------------------------------------------------
# host-side, once-per-graph preprocessing
# --------------------------------------------------------------------------
class _EdgePlan:
    pass


def build_edge_plan(src, dst, edge_type, n_nodes, n_relations):
    """Relation grouping + dst-sorted segment layout (compute ONCE per graph)."""
    src = np.asarray(src, dtype=np.int64)
    dst = np.asarray(dst, dtype=np.int64)
    et = np.asarray(edge_type, dtype=np.int64)
    E = int(src.shape[0])
    assert E > 0 and np.all((et >= 0) & (et < n_relations)), "bad edge_type"

    # ---- relation grouping for the score kernel ----
    slot_of_edge = np.zeros(E, dtype=np.int64)
    src_chunks, dst_chunks, tile_rel = [], [], []
    cursor = 0
    for r in range(n_relations):
        idx = np.nonzero(et == r)[0]
        k = idx.shape[0]
        if k == 0:
            continue
        n_t = -(-k // EDGE_TILE)
        pad = n_t * EDGE_TILE
        s = np.zeros(pad, dtype=np.int32)
        d = np.zeros(pad, dtype=np.int32)
        s[:k] = src[idx]
        d[:k] = dst[idx]
        src_chunks.append(s)
        dst_chunks.append(d)
        slot_of_edge[idx] = cursor + np.arange(k)
        tile_rel.extend([r] * n_t)
        cursor += pad

    plan = _EdgePlan()
    plan.E = E
    plan.n_rel_tiles = len(tile_rel)
    plan.tile_rel = np.asarray(tile_rel, dtype=np.int32)
    plan.src_rel = np.concatenate(src_chunks)
    plan.dst_rel = np.concatenate(dst_chunks)

    # ---- dst-sorted layout for the segmented edge-softmax ----
    perm = np.argsort(dst, kind="stable")
    dst_sorted = dst[perm]
    n_sweep = -(-E // SWEEP_TILE)
    E_sw = n_sweep * SWEEP_TILE
    dst_sw = np.full(E_sw, -1, dtype=np.int32)          # -1 sentinel never matches
    dst_sw[:E] = dst_sorted
    slot_sw = np.zeros(E_sw, dtype=np.int32)            # sorted pos -> rel-grouped slot
    slot_sw[:E] = slot_of_edge[perm]
    inv_pos = np.empty(E, dtype=np.int64)                # original edge -> sorted pos
    inv_pos[perm] = np.arange(E)

    n_node_tiles = -(-n_nodes // NODE_TILE)
    first = np.zeros(n_node_tiles, dtype=np.int64)
    span = np.zeros(n_node_tiles, dtype=np.int64)
    for nt in range(n_node_tiles):
        lo = np.searchsorted(dst_sorted, nt * NODE_TILE, side="left")
        hi = np.searchsorted(dst_sorted, (nt + 1) * NODE_TILE, side="left")
        if hi > lo:
            f = lo // SWEEP_TILE
            l = (hi - 1) // SWEEP_TILE
            first[nt] = f
            span[nt] = l - f + 1
    max_span = max(1, int(span.max()))
    # visit[nt, e] = edge-tile index the (nt, e) grid step should load (clamped).
    visit = np.zeros((n_node_tiles, max_span), dtype=np.int32)
    for nt in range(n_node_tiles):
        if span[nt] > 0:
            for e in range(max_span):
                visit[nt, e] = int(first[nt] + min(e, span[nt] - 1))

    plan.n_sweep_tiles = n_sweep
    plan.n_node_tiles = n_node_tiles
    plan.max_span = max_span
    plan.dst_sorted_pad = dst_sw
    plan.sorted_slot = slot_sw
    plan.inv_pos = inv_pos.astype(np.int32)
    plan.visit_flat = visit.reshape(-1)                  # 1-D to keep SMEM padding small
    plan.span = span.astype(np.int32)
    return plan


# --------------------------------------------------------------------------
# full calc_att pipeline
# --------------------------------------------------------------------------
def kgat_calc_att(src_ids, dst_ids, edge_type,
                  entity_user_embed, relation_embed, W_R, plan=None):
    """Pallas implementation of KGAT.forward('calc_att', g)."""
    E = int(src_ids.shape[0])
    N, D_e = entity_user_embed.shape
    R, D_r = relation_embed.shape
    if plan is None:
        plan = build_edge_plan(np.asarray(jax.device_get(src_ids)),
                               np.asarray(jax.device_get(dst_ids)),
                               np.asarray(jax.device_get(edge_type)), N, R)

    n_rt = plan.n_rel_tiles

    # ---- device operand prep (embedding gathers are XLA glue; no relayout pass) ----
    emb_bf = entity_user_embed.astype(jnp.bfloat16)
    src_g = emb_bf[jnp.asarray(plan.src_rel)].reshape(n_rt, EDGE_TILE, D_e)
    dst_g = emb_bf[jnp.asarray(plan.dst_rel)].reshape(n_rt, EDGE_TILE, D_e)
    W_T = jnp.swapaxes(W_R, 1, 2).astype(jnp.bfloat16)        # (R, D_r, D_e), tiny
    rel_col = relation_embed.astype(jnp.float32)[:, :, None]  # (R, D_r, 1)
    tile_rel = jnp.asarray(plan.tile_rel)

    # ---- kernel 1: per-edge scores, one fused bf16 matmul pair per 512-edge tile ----
    scores = pl.pallas_call(
        score_kernel,
        out_shape=jax.ShapeDtypeStruct((n_rt, 1, EDGE_TILE), jnp.float32),
        grid_spec=pltpu.PrefetchScalarGridSpec(
            num_scalar_prefetch=1,
            grid=(n_rt,),
            in_specs=[
                pl.BlockSpec((1, EDGE_TILE, D_e), lambda t, tr: (t, 0, 0)),
                pl.BlockSpec((1, EDGE_TILE, D_e), lambda t, tr: (t, 0, 0)),
                pl.BlockSpec((R, D_r, D_e), lambda t, tr: (0, 0, 0)),   # resident
                pl.BlockSpec((R, D_r, 1), lambda t, tr: (0, 0, 0)),     # resident
            ],
            out_specs=pl.BlockSpec((1, 1, EDGE_TILE), lambda t, tr: (t, 0, 0)),
        ),
        compiler_params=pltpu.CompilerParams(
            dimension_semantics=("parallel",)),
    )(tile_rel, src_g, dst_g, W_T, rel_col)

    # ---- permute scores into dst-sorted, lane-dense layout (cheap XLA gather) ----
    NSW, NNT, MS = plan.n_sweep_tiles, plan.n_node_tiles, plan.max_span
    scores_flat = scores.reshape(-1)
    dst_sw = jnp.asarray(plan.dst_sorted_pad)
    valid = dst_sw >= 0
    s_sorted = jnp.where(valid, scores_flat[jnp.asarray(plan.sorted_slot)], 0.0)
    dst_lane = dst_sw.reshape(NSW, 1, SWEEP_TILE)
    s_lane = s_sorted.reshape(NSW, 1, SWEEP_TILE)

    visit = jnp.asarray(plan.visit_flat)
    span = jnp.asarray(plan.span)

    def edge_map(n, e, visit_ref, span_ref):
        return (visit_ref[n * MS + e], 0, 0)

    def node_map(n, e, visit_ref, span_ref):
        return (n, 0, 0)

    sweep_params = pltpu.CompilerParams(
        dimension_semantics=("parallel", "arbitrary"))

    # ---- kernel 2a: segmented per-node max (no exp) ----
    m_node = pl.pallas_call(
        seg_max_kernel,
        out_shape=jax.ShapeDtypeStruct((NNT, NODE_TILE, 1), jnp.float32),
        grid_spec=pltpu.PrefetchScalarGridSpec(
            num_scalar_prefetch=2,
            grid=(NNT, MS),
            in_specs=[pl.BlockSpec((1, 1, SWEEP_TILE), edge_map),
                      pl.BlockSpec((1, 1, SWEEP_TILE), edge_map)],
            out_specs=pl.BlockSpec((1, NODE_TILE, 1), node_map),
        ),
        compiler_params=sweep_params,
    )(visit, span, dst_lane, s_lane)

    # ---- XLA glue: exactly one exp per edge (fuses with the stat gather) ----
    N_pad = NNT * NODE_TILE
    m_flat = m_node.reshape(-1)
    safe_dst = jnp.clip(dst_sw, 0, N_pad - 1)
    m_edge = jnp.where(valid, m_flat[safe_dst], 0.0)
    p_sorted = jnp.where(valid, jnp.exp(s_sorted - m_edge), 0.0)
    p_lane = p_sorted.reshape(NSW, 1, SWEEP_TILE)

    # ---- kernel 2b: segmented per-node sum of exp ----
    l_node = pl.pallas_call(
        seg_sum_kernel,
        out_shape=jax.ShapeDtypeStruct((NNT, NODE_TILE, 1), jnp.float32),
        grid_spec=pltpu.PrefetchScalarGridSpec(
            num_scalar_prefetch=2,
            grid=(NNT, MS),
            in_specs=[pl.BlockSpec((1, 1, SWEEP_TILE), edge_map),
                      pl.BlockSpec((1, 1, SWEEP_TILE), edge_map)],
            out_specs=pl.BlockSpec((1, NODE_TILE, 1), node_map),
        ),
        compiler_params=sweep_params,
    )(visit, span, dst_lane, p_lane)

    # ---- normalization fused in XLA (old kernel 3 removed), back to edge order ----
    l_flat = l_node.reshape(-1)
    l_edge = jnp.where(valid, l_flat[safe_dst], 1.0)
    att_sorted = p_sorted / l_edge
    att = att_sorted[jnp.asarray(plan.inv_pos)]
    return att.reshape(E, 1)


# --------------------------------------------------------------------------
# pure-JAX f32 reference of KGAT.compute_attention
# --------------------------------------------------------------------------
def kgat_calc_att_ref(src_ids, dst_ids, edge_type,
                      entity_user_embed, relation_embed, W_R):
    W_e = W_R[edge_type]                                  # (E, D_e, D_r)
    src_emb = entity_user_embed[src_ids]
    dst_emb = entity_user_embed[dst_ids]
    r_mul_t = jnp.einsum('ed,edr->er', src_emb, W_e)
    r_mul_h = jnp.einsum('ed,edr->er', dst_emb, W_e)
    r_embed = relation_embed[edge_type]
    att = jnp.sum(r_mul_t * jnp.tanh(r_mul_h + r_embed), axis=-1)
    N = entity_user_embed.shape[0]
    m = jax.ops.segment_max(att, dst_ids, num_segments=N)
    e = jnp.exp(att - m[dst_ids])
    s = jax.ops.segment_sum(e, dst_ids, num_segments=N)
    return (e / s[dst_ids]).reshape(-1, 1)


if __name__ == "__main__":
    # Small, deterministic synthetic setup consistent with KGAT.__init__
    n_users = 8
    n_entities = 24
    n_relations = 4
    entity_dim = 32
    relation_dim = 16
    n_nodes = n_entities + n_users
    n_edges = 64

    key = jax.random.PRNGKey(0)
    k_ent, k_rel, k_wr, k_src, k_dst, k_typ = jax.random.split(key, 6)

    entity_user_embed = jax.random.normal(
        k_ent, (n_nodes, entity_dim), dtype=jnp.float32) * 0.1
    relation_embed = jax.random.normal(
        k_rel, (n_relations, relation_dim), dtype=jnp.float32) * 0.1
    W_R = jax.random.normal(
        k_wr, (n_relations, entity_dim, relation_dim), dtype=jnp.float32) * 0.1

    src_ids = jax.random.randint(k_src, (n_edges,), 0, n_nodes, dtype=jnp.int32)
    dst_ids = jax.random.randint(k_dst, (n_edges,), 0, n_nodes, dtype=jnp.int32)
    edge_type = jax.random.randint(k_typ, (n_edges,), 0, n_relations,
                                   dtype=jnp.int32)

    # once-per-graph host preprocessing (reused across calls)
    plan = build_edge_plan(np.asarray(jax.device_get(src_ids)),
                           np.asarray(jax.device_get(dst_ids)),
                           np.asarray(jax.device_get(edge_type)),
                           n_nodes, n_relations)

    att = kgat_calc_att(src_ids, dst_ids, edge_type,
                        entity_user_embed, relation_embed, W_R, plan=plan)
    att = jax.block_until_ready(att)

    att_ref = kgat_calc_att_ref(src_ids, dst_ids, edge_type,
                                entity_user_embed, relation_embed, W_R)
    att_ref = jax.block_until_ready(att_ref)

    assert att.shape == (n_edges, 1)
    # tolerance covers bf16 MXU inputs; softmax itself is exact f32
    assert jnp.allclose(att, att_ref, rtol=2e-2, atol=1e-3), "mismatch vs reference"

    print("KERNEL_OK")
</pallas_src>

<mosaic_0001>
module attributes {stable_mosaic.version = 11 : i64} {
  func.func @score_kernel(%arg0: i32, %arg1: memref<4xi32, #tpu.memory_space<smem>>, %arg2: memref<1x512x32xbf16, #tpu.memory_space<vmem>>, %arg3: memref<1x512x32xbf16, #tpu.memory_space<vmem>>, %arg4: memref<4x16x32xbf16, #tpu.memory_space<vmem>>, %arg5: memref<4x16x1xf32, #tpu.memory_space<vmem>>, %arg6: memref<1x1x512xf32, #tpu.memory_space<vmem>>) attributes {dimension_semantics = [#tpu.dimension_semantics<parallel>], iteration_bounds = array<i64: 4>, scalar_prefetch = 1 : i64, scratch_operands = 0 : i64, tpu.core_type = #tpu.core_type<tc>, window_params = [{transform_indices = @transform_0, window_bounds = array<i64: 1, 512, 32>}, {transform_indices = @transform_1, window_bounds = array<i64: 1, 512, 32>}, {pipeline_mode = #tpu.pipeline_mode<synchronous>, transform_indices = @transform_2, window_bounds = array<i64: 4, 16, 32>}, {pipeline_mode = #tpu.pipeline_mode<synchronous>, transform_indices = @transform_3, window_bounds = array<i64: 4, 16, 1>}, {transform_indices = @transform_4, window_bounds = array<i64: 1, 1, 512>}]} {
    %0 = arith.index_cast %arg0 : i32 to index
    %1 = memref.load %arg1[%0] : memref<4xi32, #tpu.memory_space<smem>>
    %2 = arith.index_cast %1 : i32 to index
    %c0 = arith.constant 0 : index
    %c0_0 = arith.constant 0 : index
    %3 = vector.load %arg4[%2, %c0, %c0_0] : memref<4x16x32xbf16, #tpu.memory_space<vmem>>, vector<1x16x32xbf16>
    %4 = vector.shape_cast %3 : vector<1x16x32xbf16> to vector<16x32xbf16>
    %c0_1 = arith.constant 0 : index
    %c0_2 = arith.constant 0 : index
    %c0_3 = arith.constant 0 : index
    %5 = vector.load %arg2[%c0_1, %c0_2, %c0_3] : memref<1x512x32xbf16, #tpu.memory_space<vmem>>, vector<1x512x32xbf16>
    %6 = vector.shape_cast %5 : vector<1x512x32xbf16> to vector<512x32xbf16>
    %cst = arith.constant dense<0.000000e+00> : vector<16x512xf32>
    %7 = tpu.matmul %4, %6, %cst {dimension_numbers = #tpu.dot_dimension_numbers<[1], [1], [0], [0], [0, 0, 1, 0], [], []>} : vector<16x32xbf16>, vector<512x32xbf16>, vector<16x512xf32> -> vector<16x512xf32>
    %c0_4 = arith.constant 0 : index
    %c0_5 = arith.constant 0 : index
    %c0_6 = arith.constant 0 : index
    %8 = vector.load %arg3[%c0_4, %c0_5, %c0_6] : memref<1x512x32xbf16, #tpu.memory_space<vmem>>, vector<1x512x32xbf16>
    %9 = vector.shape_cast %8 : vector<1x512x32xbf16> to vector<512x32xbf16>
    %cst_7 = arith.constant dense<0.000000e+00> : vector<16x512xf32>
    %10 = tpu.matmul %4, %9, %cst_7 {dimension_numbers = #tpu.dot_dimension_numbers<[1], [1], [0], [0], [0, 0, 1, 0], [], []>} : vector<16x32xbf16>, vector<512x32xbf16>, vector<16x512xf32> -> vector<16x512xf32>
    %11 = arith.index_cast %1 : i32 to index
    %c0_8 = arith.constant 0 : index
    %c0_9 = arith.constant 0 : index
    %12 = vector.load %arg5[%11, %c0_8, %c0_9] : memref<4x16x1xf32, #tpu.memory_space<vmem>>, vector<1x16x1xf32>
    %13 = vector.shape_cast %12 : vector<1x16x1xf32> to vector<16x1xf32>
    %14 = vector.broadcast %13 : vector<16x1xf32> to vector<16x512xf32>
    %15 = arith.addf %10, %14 : vector<16x512xf32>
    %16 = math.tanh %15 : vector<16x512xf32>
    %17 = arith.mulf %7, %16 : vector<16x512xf32>
    %cst_10 = arith.constant dense<0.000000e+00> : vector<512xf32>
    %18 = vector.multi_reduction <add>, %17, %cst_10 [0] : vector<16x512xf32> to vector<512xf32>
    %19 = vector.shape_cast %18 : vector<512xf32> to vector<1x512xf32>
    %c0_11 = arith.constant 0 : index
    %c0_12 = arith.constant 0 : index
    %c0_13 = arith.constant 0 : index
    %20 = vector.load %arg6[%c0_11, %c0_12, %c0_13] : memref<1x1x512xf32, #tpu.memory_space<vmem>>, vector<1x1x512xf32>
    %21 = vector.shape_cast %20 : vector<1x1x512xf32> to vector<1x512xf32>
    %22 = vector.shape_cast %19 : vector<1x512xf32> to vector<1x1x512xf32>
    tpu.vector_store %arg6[%c0_11, %c0_12, %c0_13], %22 {strides = array<i32>} : memref<1x1x512xf32, #tpu.memory_space<vmem>>, vector<1x1x512xf32>,
    return
  }
  func.func @transform_0(%arg0: i32, %arg1: memref<4xi32, #tpu.memory_space<smem>>) -> (i32, i32, i32) {
    %c0_i32 = arith.constant 0 : i32
    %c0_i32_0 = arith.constant 0 : i32
    %c0_i32_1 = arith.constant 0 : i32
    return %arg0, %c0_i32, %c0_i32_0 : i32, i32, i32
  }
  func.func @transform_1(%arg0: i32, %arg1: memref<4xi32, #tpu.memory_space<smem>>) -> (i32, i32, i32) {
    %c0_i32 = arith.constant 0 : i32
    %c0_i32_0 = arith.constant 0 : i32
    %c0_i32_1 = arith.constant 0 : i32
    return %arg0, %c0_i32, %c0_i32_0 : i32, i32, i32
  }
  func.func @transform_2(%arg0: i32, %arg1: memref<4xi32, #tpu.memory_space<smem>>) -> (i32, i32, i32) {
    %c0_i32 = arith.constant 0 : i32
    %c0_i32_0 = arith.constant 0 : i32
    %c0_i32_1 = arith.constant 0 : i32
    %c0_i32_2 = arith.constant 0 : i32
    return %c0_i32, %c0_i32_0, %c0_i32_1 : i32, i32, i32
  }
  func.func @transform_3(%arg0: i32, %arg1: memref<4xi32, #tpu.memory_space<smem>>) -> (i32, i32, i32) {
    %c0_i32 = arith.constant 0 : i32
    %c0_i32_0 = arith.constant 0 : i32
    %c0_i32_1 = arith.constant 0 : i32
    %c0_i32_2 = arith.constant 0 : i32
    return %c0_i32, %c0_i32_0, %c0_i32_1 : i32, i32, i32
  }
  func.func @transform_4(%arg0: i32, %arg1: memref<4xi32, #tpu.memory_space<smem>>) -> (i32, i32, i32) {
    %c0_i32 = arith.constant 0 : i32
    %c0_i32_0 = arith.constant 0 : i32
    %c0_i32_1 = arith.constant 0 : i32
    return %arg0, %c0_i32, %c0_i32_0 : i32, i32, i32
  }
}

</mosaic_0001>

<bundles_post_ra>
// kernel: tpu_custom_call.1
= control target key start
LH: loop header
LB: loop body
LE: loop exit
PB: predicated region body
PF: predicated region fallthrough
CT: control target
= control target key end

     0   :  { %s1648_s21 = smov [#allocation3]   ;;  %s1943_s0 = inlined_call_operand.vmem [shape: s32[4], index: 0, kind: input, shape index: {}]   ;;  %s1944_s1 = inlined_call_operand.vmem [shape: bf16[4,512,32], index: 1, kind: input, shape index: {}]   ;;  %s1945_s2 = inlined_call_operand.vmem [shape: bf16[4,512,32], index: 2, kind: input, shape index: {}]   ;;  %s1946_s3 = inlined_call_operand.vmem [shape: bf16[4,16,32], index: 3, kind: input, shape index: {}]   ;;  %s1947_s4 = inlined_call_operand.vmem [shape: f32[4,16,1], index: 4, kind: input, shape index: {}]   ;;  %s1948_s5 = inlined_call_operand.hbm [shape: f32[4,1,512], index: 5, kind: output, shape index: {}]  }
   0x1   :  { %s11_s20 = sshll.u32 %s1943_s0, 4  ;;  %s12_s20 = int_to_ptr.vmem [resolvable:$true] %s11_s20 }
   0x2   :  { %14 = dma.vmem_to_smem %s12_s20, 16, %s1648_s21, [#allocation2] }
   0x3   :  { %1626 = dma.done.wait [#allocation2], 16 }
   0x4   :  { %1627 = vsyncadd [#allocation2], 4294967280 }
   0x5   :  { %17 = sfence }
   0x6   :  { %18 = vsyncpa [#allocation5], 0 }
   0x7   :  { %20 = vsyncpa [#allocation5 + $0x1], 0  ;;  %s1683_s22 = smov 0   ;;  %s1685_s23 = smov 0  }
   0x8   :  { %s1687_s24 = smov 0   ;;  %s1689_s25 = smov 0  }
   0x9 LB: > { %s1704_s0 = sadd.s32 4294967295, %s1646_s25   ;;  %s1160_s26 = sadd.s32 4294967294, %s1646_s25   ;;  %s1646_s25 = sphi %s1689_s25, %s1954_s25   ;;  %s1642_s24 = sphi %s1687_s24, %s1953_s24   ;;  %s1638_s23 = sphi %s1685_s23, %s1952_s23   ;;  %s1634_s22 = sphi %s1683_s22, %s1951_s22  }
   0xa   : > { %s1708_s27 = sadd.s32 1, %s1646_s25   ;;  %s127_s28 = sadd.s32 1, %s1642_s24 }
   0xb   : > { %s124_s29 = ssub.s32 %s1646_s25, %s1708_s27  ;;  %p137_p0 = scmp.ne.s32.totalorder %s1642_s24, %s1638_s23 }
   0xc   : > { %p125_p1 = scmp.eq.s32.totalorder %s124_s29, 0  ;;  %p138_p2 = scmp.eq.s32.totalorder %s1704_s0, 3 }
   0xd   : > { %p143_p3 = scmp.ne.s32.totalorder %s1638_s23, %s1634_s22  ;;  %p144_p4 = scmp.eq.s32.totalorder %s1160_s26, 3 }
   0xe   : > { %s1719_s30 = scalar_select %p125_p1, %s1642_s24, %s127_s28  }
   0xf   : > { %p1721_p5 = por %p138_p2, %p137_p0  ;;  %p1725_p6 = por %p144_p4, %p143_p3 }
  0x10   : > { %p1163_p7 = scmp.ge.s32.totalorder %s1646_s25, 1  ;;  %p184_p8 = scmp.lt.s32.totalorder %s1646_s25, 5 }
  0x12   : > { %p185_p9 = pnand %p1163_p7, %p184_p8 }
  0x13   : > { %p215_p10 = scmp.lt.s32.totalorder (!%p185_p9), %s1704_s0, 3  ;;  %s1800_s13 = sld [smem:[#allocation3 + %s1704_s0]] (!%p185_p9) }
  0x14   : > { %188 = sbr.rel (%p185_p9) target bundleno = 333 (0x14d), region = 36  ;;  %s1441_s10 = sshll.u32 (!%p185_p9), %s1704_s0, 2 }
  0x19   : > { %s1733_s8 = scalar_select %p215_p10, %s1704_s0, 3  ;;  %vm460_vm0 = vcmask 261120   ;;  %vm1057_vm1 = vcmask 1040384   ;;  %vm1059_vm2 = vcmask 1042434   ;;  %vm1061_vm3 = vcmask 1041408  }
  0x1a   : > { %s1446_s17 = sshll.u32 %s1800_s13, 3  ;;  %s1307_s21 = sshll.u32 %s1800_s13, 4 }
  0x1b   : > { %s1444_s9 = sshll.u32 %s1733_s8, 8  ;;  %s228_s20 = scalar_lea.vmem %s1946_s3, %s1446_s17 }
  0x1c   : > { %s1741_s12 = scalar_lea.vmem %s1944_s1, %s1444_s9  ;;  %s1807_s16 = scalar_lea.vmem %s1945_s2, %s1444_s9 }
  0x1d   : > { %v1455_v0 = vld [vmem:[%s1741_s12 + $0x38] sm:$0xff]  ;;  %v1454_v8 = vld [vmem:[%s1741_s12 + $0x30] sm:$0xff]  ;;  %v1453_v16 = vld [vmem:[%s1741_s12 + $0x28] sm:$0xff]  ;;  %s681_s29 = scalar_lea.vmem %s1947_s4, %s1307_s21  ;;  %s212_s8 = sand.u32 1, %s1638_s23  }
  0x1e   : > { %v1463_v1 = vld [vmem:[%s1741_s12 + $0x78] sm:$0xff]  ;;  %v486_v4 = vsel %vm460_vm0, %v1455_v0, 0  ;;  %v1462_v9 = vld [vmem:[%s1741_s12 + $0x70] sm:$0xff]  ;;  %v483_v12 = vsel %vm460_vm0, %v1454_v8, 0  ;;  %v1461_v17 = vld [vmem:[%s1741_s12 + $0x68] sm:$0xff]  ;;  %v480_v20 = vsel %vm460_vm0, %v1453_v16, 0  ;;  %s1080_s13 = scalar_lea.hbm %s1948_s5, %s1441_s10 }
  0x1f   : > { %v1471_v2 = vld [vmem:[%s1741_s12 + $0xb8] sm:$0xff]  ;;  %v510_v5 = vsel %vm460_vm0, %v1463_v1, 0  ;;  %560 = vmatpush.bf16.xpose.msra.mxu0 %v486_v4  ;;  %v1470_v10 = vld [vmem:[%s1741_s12 + $0xb0] sm:$0xff]  ;;  %v507_v13 = vsel %vm460_vm0, %v1462_v9, 0  ;;  %v1469_v18 = vld [vmem:[%s1741_s12 + $0xa8] sm:$0xff]  ;;  %v504_v21 = vsel %vm460_vm0, %v1461_v17, 0 }
  0x20   : > { %v1479_v3 = vld [vmem:[%s1741_s12 + $0xf8] sm:$0xff]  ;;  %v534_v6 = vsel %vm460_vm0, %v1471_v2, 0  ;;  %574 = vmatpush.bf16.xpose.msra.mxu1 %v510_v5  ;;  %v1478_v11 = vld [vmem:[%s1741_s12 + $0xf0] sm:$0xff]  ;;  %v531_v14 = vsel %vm460_vm0, %v1470_v10, 0  ;;  %v1477_v19 = vld [vmem:[%s1741_s12 + $0xe8] sm:$0xff]  ;;  %v528_v22 = vsel %vm460_vm0, %v1469_v18, 0 }
  0x21   : > { %v558_v7 = vsel %vm460_vm0, %v1479_v3, 0  ;;  %588 = vmatpush.bf16.xpose.msra.mxu2 %v534_v6  ;;  %v555_v15 = vsel %vm460_vm0, %v1478_v11, 0  ;;  %v552_v23 = vsel %vm460_vm0, %v1477_v19, 0  ;;  %v1452_v24 = vld [vmem:[%s1741_s12 + $0x20] sm:$0xff]  ;;  %v1451_v32 = vld [vmem:[%s1741_s12 + $0x18] sm:$0xff]  ;;  %v1450_v40 = vld [vmem:[%s1741_s12 + $0x10] sm:$0xff] }
  0x22   : > { %602 = vmatpush.bf16.xpose.msra.mxu3 %v558_v7  ;;  %v1460_v25 = vld [vmem:[%s1741_s12 + $0x60] sm:$0xff]  ;;  %v477_v28 = vsel %vm460_vm0, %v1452_v24, 0  ;;  %v1459_v33 = vld [vmem:[%s1741_s12 + $0x58] sm:$0xff]  ;;  %v474_v36 = vsel %vm460_vm0, %v1451_v32, 0  ;;  %v1458_v41 = vld [vmem:[%s1741_s12 + $0x50] sm:$0xff]  ;;  %v471_v44 = vsel %vm460_vm0, %v1450_v40, 0 }
  0x23   : > { %v1468_v26 = vld [vmem:[%s1741_s12 + $0xa0] sm:$0xff]  ;;  %v501_v29 = vsel %vm460_vm0, %v1460_v25, 0  ;;  %v1467_v34 = vld [vmem:[%s1741_s12 + $0x98] sm:$0xff]  ;;  %v498_v37 = vsel %vm460_vm0, %v1459_v33, 0  ;;  %v1466_v42 = vld [vmem:[%s1741_s12 + $0x90] sm:$0xff]  ;;  %v495_v45 = vsel %vm460_vm0, %v1458_v41, 0 }
  0x24   : > { %v1476_v27 = vld [vmem:[%s1741_s12 + $0xe0] sm:$0xff]  ;;  %v525_v30 = vsel %vm460_vm0, %v1468_v26, 0  ;;  %v1475_v35 = vld [vmem:[%s1741_s12 + $0xd8] sm:$0xff]  ;;  %v522_v38 = vsel %vm460_vm0, %v1467_v34, 0  ;;  %v1474_v43 = vld [vmem:[%s1741_s12 + $0xd0] sm:$0xff]  ;;  %v519_v46 = vsel %vm460_vm0, %v1466_v42, 0 }
  0x25   : > { %v549_v31 = vsel %vm460_vm0, %v1476_v27, 0  ;;  %v546_v39 = vsel %vm460_vm0, %v1475_v35, 0  ;;  %v543_v47 = vsel %vm460_vm0, %v1474_v43, 0  ;;  %v1449_v48 = vld [vmem:[%s1741_s12 + $0x8] sm:$0xff]  ;;  %v1448_v56 = vld [vmem:[%s1741_s12] sm:$0xff]  ;;  %v1487_v60 = vld [vmem:[%s1807_s16 + $0x38] sm:$0xff] }
  0x26   : > { %v1457_v49 = vld [vmem:[%s1741_s12 + $0x48] sm:$0xff]  ;;  %v468_v52 = vsel %vm460_vm0, %v1449_v48, 0  ;;  %v1456_v57 = vld [vmem:[%s1741_s12 + $0x40] sm:$0xff]  ;;  %v1495_v61 = vld [vmem:[%s1807_s16 + $0x78] sm:$0xff]  ;;  %v465_v0 = vsel %vm460_vm0, %v1448_v56, 0  ;;  %v876_v4 = vsel %vm460_vm0, %v1487_v60, 0 }
  0x27   : > { %561 = vmatpush.bf16.xpose.msra.mxu0 %v483_v12  ;;  %v1465_v50 = vld [vmem:[%s1741_s12 + $0x88] sm:$0xff]  ;;  %v492_v53 = vsel %vm460_vm0, %v1457_v49, 0  ;;  %v1464_v58 = vld [vmem:[%s1741_s12 + $0x80] sm:$0xff]  ;;  %v1503_v62 = vld [vmem:[%s1807_s16 + $0xb8] sm:$0xff]  ;;  %v489_v1 = vsel %vm460_vm0, %v1456_v57, 0  ;;  %v900_v5 = vsel %vm460_vm0, %v1495_v61, 0 }
  0x28   : > { %575 = vmatpush.bf16.xpose.msra.mxu1 %v507_v13  ;;  %v1473_v51 = vld [vmem:[%s1741_s12 + $0xc8] sm:$0xff]  ;;  %v516_v54 = vsel %vm460_vm0, %v1465_v50, 0  ;;  %v1472_v59 = vld [vmem:[%s1741_s12 + $0xc0] sm:$0xff]  ;;  %v1511_v63 = vld [vmem:[%s1807_s16 + $0xf8] sm:$0xff]  ;;  %v513_v2 = vsel %vm460_vm0, %v1464_v58, 0  ;;  %v924_v6 = vsel %vm460_vm0, %v1503_v62, 0 }
  0x29   : > { %589 = vmatpush.bf16.xpose.msra.mxu2 %v531_v14  ;;  %v540_v55 = vsel %vm460_vm0, %v1473_v51, 0  ;;  %v537_v3 = vsel %vm460_vm0, %v1472_v59, 0  ;;  %v948_v7 = vsel %vm460_vm0, %v1511_v63, 0  ;;  %v1486_v8 = vld [vmem:[%s1807_s16 + $0x30] sm:$0xff]  ;;  %v1833_v12 = vld [vmem:[%s228_s20] sm:$0xff]  ;;  %v1485_v17 = vld [vmem:[%s1807_s16 + $0x28] sm:$0xff] }
  0x2a   : > { %603 = vmatpush.bf16.xpose.msra.mxu3 %v555_v15  ;;  %v1494_v9 = vld [vmem:[%s1807_s16 + $0x70] sm:$0xff]  ;;  %v873_v13 = vsel %vm460_vm0, %v1486_v8, 0  ;;  %v1493_v18 = vld [vmem:[%s1807_s16 + $0x68] sm:$0xff]  ;;  %v1484_v25 = vld [vmem:[%s1807_s16 + $0x20] sm:$0xff]  ;;  %s1164_s9 = sshll.u32 %s212_s8, 2  ;;  %s1084_s0 = sshll.u32 %s1080_s13, 4  ;;  %s1085_s0 = int_to_ptr.hbm [resolvable:$true] %s1084_s0 }
  0x2b   : > { %v1502_v10 = vld [vmem:[%s1807_s16 + $0xb0] sm:$0xff]  ;;  %v897_v14 = vsel %vm460_vm0, %v1494_v9, 0  ;;  %v1501_v19 = vld [vmem:[%s1807_s16 + $0xa8] sm:$0xff]  ;;  %v1492_v26 = vld [vmem:[%s1807_s16 + $0x60] sm:$0xff]  ;;  %s214_s14 = scalar_lea.vmem [#allocation4], %s1164_s9  ;;  %s1596_s17 = sshra.s32 %s1085_s0, 4  ;;  %s1597_s17 = int_to_ptr.hbm [resolvable:$true] %s1596_s17 }
  0x2c   : > { %v1510_v11 = vld [vmem:[%s1807_s16 + $0xf0] sm:$0xff]  ;;  %v921_v15 = vsel %vm460_vm0, %v1502_v10, 0  ;;  %v1500_v27 = vld [vmem:[%s1807_s16 + $0xa0] sm:$0xff]  ;;  %v1483_v33 = vld [vmem:[%s1807_s16 + $0x18] sm:$0xff]  ;;  %s1082_s15 = sshll.u32 %s214_s14, 4  ;;  %s1598_s18 = scalar_lea.hbm %s1597_s17, 4  ;;  %s1083_s15 = int_to_ptr.vmem [resolvable:$true] %s1082_s15 }
  0x2d   : > { %v945_v16 = vsel %vm460_vm0, %v1510_v11, 0  ;;  %v1491_v34 = vld [vmem:[%s1807_s16 + $0x58] sm:$0xff]  ;;  %v682_v41 = vld [vmem:[%s681_s29] sm:$0xff]  ;;  %v1482_v42 = vld [vmem:[%s1807_s16 + $0x10] sm:$0xff]  ;;  %p1599_p11 = scmp.ne.s32.totalorder %s1597_s17, %s1598_s18  ;;  %s1602_s21 = scalar_lea.hbm %s1948_s5, 16 }
  0x2e   : > { %v1499_v35 = vld [vmem:[%s1807_s16 + $0x98] sm:$0xff]  ;;  %v1490_v43 = vld [vmem:[%s1807_s16 + $0x50] sm:$0xff]  ;;  %v683_v51 = vld [vmem:[%s681_s29 + $0x8] sm:$0xff]  ;;  %p1603_p0 = scmp.lt.s32.totalorder %s1597_s17, %s1948_s5  ;;  %p1604_p1 = scmp.lt.s32.totalorder %s1602_s21, %s1598_s18 }
  0x2f   : > { %562 = vmatpush.bf16.xpose.msra.mxu0 %v480_v20  ;;  %v1509_v20 = vld [vmem:[%s1807_s16 + $0xe8] sm:$0xff]  ;;  %v885_v48 = vsel %vm460_vm0, %v1490_v43, 0  ;;  %v1480_v60 = vld [vmem:[%s1807_s16] sm:$0xff]  ;;  %p1600_p12 = pnand %p1599_p11, %p1721_p5 }
  0x30   : > { %576 = vmatpush.bf16.xpose.msra.mxu1 %v504_v21  ;;  %v870_v21 = vsel %vm460_vm0, %v1485_v17, 0  ;;  %v942_v24 = vsel %vm460_vm0, %v1509_v20, 0  ;;  %v1488_v61 = vld [vmem:[%s1807_s16 + $0x40] sm:$0xff]  ;;  %p1605_p2 = por %p1604_p1, %p1603_p0 }
  0x31   : > { %590 = vmatpush.bf16.xpose.msra.mxu2 %v528_v22  ;;  %v894_v22 = vsel %vm460_vm0, %v1493_v18, 0  ;;  %v1496_v62 = vld [vmem:[%s1807_s16 + $0x80] sm:$0xff]  ;;  %p1601_p13 = pneg %p1600_p12 }
  0x32   : > { %604 = vmatpush.bf16.xpose.msra.mxu3 %v552_v23  ;;  %v918_v23 = vsel %vm460_vm0, %v1501_v19, 0  ;;  %v1504_v63 = vld [vmem:[%s1807_s16 + $0xc0] sm:$0xff] }
  0x33   : > { %p1606_p3 = pnand %p1605_p2, %p1601_p13 }
  0x37   : > { %563 = vmatpush.bf16.xpose.msra.mxu0 %v477_v28  ;;  %v1508_v28 = vld [vmem:[%s1807_s16 + $0xe0] sm:$0xff] }
  0x38   : > { %577 = vmatpush.bf16.xpose.msra.mxu1 %v501_v29  ;;  %v867_v29 = vsel %vm460_vm0, %v1484_v25, 0  ;;  %v939_v32 = vsel %vm460_vm0, %v1508_v28, 0 }
  0x39   : > { %591 = vmatpush.bf16.xpose.msra.mxu2 %v525_v30  ;;  %v891_v30 = vsel %vm460_vm0, %v1492_v26, 0 }
  0x3a   : > { %605 = vmatpush.bf16.xpose.msra.mxu3 %v549_v31  ;;  %v915_v31 = vsel %vm460_vm0, %v1500_v27, 0 }
  0x3f   : > { %564 = vmatpush.bf16.xpose.msra.mxu0 %v474_v36  ;;  %v1507_v36 = vld [vmem:[%s1807_s16 + $0xd8] sm:$0xff] }
  0x40   : > { %578 = vmatpush.bf16.xpose.msra.mxu1 %v498_v37  ;;  %v864_v37 = vsel %vm460_vm0, %v1483_v33, 0  ;;  %v936_v40 = vsel %vm460_vm0, %v1507_v36, 0 }
  0x41   : > { %592 = vmatpush.bf16.xpose.msra.mxu2 %v522_v38  ;;  %v888_v38 = vsel %vm460_vm0, %v1491_v34, 0 }
  0x42   : > { %606 = vmatpush.bf16.xpose.msra.mxu3 %v546_v39  ;;  %v912_v39 = vsel %vm460_vm0, %v1499_v35, 0 }
  0x47   : > { %565 = vmatpush.bf16.xpose.msra.mxu0 %v471_v44  ;;  %v1498_v44 = vld [vmem:[%s1807_s16 + $0x90] sm:$0xff] }
  0x48   : > { %579 = vmatpush.bf16.xpose.msra.mxu1 %v495_v45  ;;  %v1506_v45 = vld [vmem:[%s1807_s16 + $0xd0] sm:$0xff]  ;;  %v909_v49 = vsel %vm460_vm0, %v1498_v44, 0 }
  0x49   : > { %593 = vmatpush.bf16.xpose.msra.mxu2 %v519_v46  ;;  %v1649_v46 = vmov 0   ;;  %v933_v50 = vsel %vm460_vm0, %v1506_v45, 0 }
  0x4a   : > { %607 = vmatpush.bf16.xpose.msra.mxu3 %v543_v47  ;;  %1553 = vset.pattern.permute.xlu0 %v1649_v46  ;;  %v861_v47 = vsel %vm460_vm0, %v1482_v42, 0 }
  0x4b   : > { %686 = vperm.xlu0 %1553, %v682_v41  }
  0x4f   : > { %566 = vmatpush.bf16.xpose.msra.mxu0 %v468_v52  ;;  %v1481_v52 = vld [vmem:[%s1807_s16 + $0x8] sm:$0xff] }
  0x50   : > { %580 = vmatpush.bf16.xpose.msra.mxu1 %v492_v53  ;;  %v1489_v53 = vld [vmem:[%s1807_s16 + $0x48] sm:$0xff]  ;;  %v858_v56 = vsel %vm460_vm0, %v1481_v52, 0 }
  0x51   : > { %594 = vmatpush.bf16.xpose.msra.mxu2 %v516_v54  ;;  %v1497_v54 = vld [vmem:[%s1807_s16 + $0x88] sm:$0xff]  ;;  %v882_v57 = vsel %vm460_vm0, %v1489_v53, 0 }
  0x52   : > { %608 = vmatpush.bf16.xpose.msra.mxu3 %v540_v55  ;;  %v1505_v55 = vld [vmem:[%s1807_s16 + $0xc8] sm:$0xff]  ;;  %v906_v58 = vsel %vm460_vm0, %v1497_v54, 0  ;;  %s1070_s16 = scalar_lea.sflag [#allocation5], %s212_s8 }
  0x53   : > { %691 = vperm.xlu0 %1553, %v683_v51   ;;  %v930_v59 = vsel %vm460_vm0, %v1505_v55, 0 }
  0x57   : > { %567 = vmatpush.bf16.xpose.msra.mxu0 %v465_v0  ;;  %v855_v0 = vsel %vm460_vm0, %v1480_v60, 0 }
  0x58   : > { %581 = vmatpush.bf16.xpose.msra.mxu1 %v489_v1  ;;  %v879_v1 = vsel %vm460_vm0, %v1488_v61, 0 }
  0x59   : > { %595 = vmatpush.bf16.xpose.msra.mxu2 %v513_v2  ;;  %v903_v2 = vsel %vm460_vm0, %v1496_v62, 0 }
  0x5a   : > { %609 = vmatpush.bf16.xpose.msra.mxu3 %v537_v3  ;;  %v927_v3 = vsel %vm460_vm0, %v1504_v63, 0 }
  0x5e   : > { %1303 = vmatmul.msk.bf16.vlgmr.msra.gmra.mxu0 %vm460_vm0, %v1833_v12 }
  0x5f   : > { %950 = vmatpush.bf16.xpose.msrb.mxu0 %v876_v4  ;;  %1304 = vmatmul.msk.bf16.vlgmr.msra.gmra.mxu1 %vm460_vm0, %v1833_v12 }
  0x60   : > { %964 = vmatpush.bf16.xpose.msrb.mxu1 %v900_v5  ;;  %1305 = vmatmul.msk.bf16.vlgmr.msra.gmra.mxu2 %vm460_vm0, %v1833_v12 }
  0x61   : > { %978 = vmatpush.bf16.xpose.msrb.mxu2 %v924_v6  ;;  %1306 = vmatmul.msk.bf16.vlgmr.msra.gmra.mxu3 %vm460_vm0, %v1833_v12 }
  0x62   : > { %992 = vmatpush.bf16.xpose.msrb.mxu3 %v948_v7 }
  0x67   : > { %951 = vmatpush.bf16.xpose.msrb.mxu0 %v873_v13 }
  0x68   : > { %965 = vmatpush.bf16.xpose.msrb.mxu1 %v897_v14 }
  0x69   : > { %979 = vmatpush.bf16.xpose.msrb.mxu2 %v921_v15 }
  0x6a   : > { %993 = vmatpush.bf16.xpose.msrb.mxu3 %v945_v16 }
  0x6f   : > { %952 = vmatpush.bf16.xpose.msrb.mxu0 %v870_v21 }
  0x70   : > { %966 = vmatpush.bf16.xpose.msrb.mxu1 %v894_v22 }
  0x71   : > { %980 = vmatpush.bf16.xpose.msrb.mxu2 %v918_v23 }
  0x72   : > { %994 = vmatpush.bf16.xpose.msrb.mxu3 %v942_v24 }
  0x77   : > { %953 = vmatpush.bf16.xpose.msrb.mxu0 %v867_v29 }
  0x78   : > { %967 = vmatpush.bf16.xpose.msrb.mxu1 %v891_v30 }
  0x79   : > { %981 = vmatpush.bf16.xpose.msrb.mxu2 %v915_v31 }
  0x7a   : > { %995 = vmatpush.bf16.xpose.msrb.mxu3 %v939_v32 }
  0x7f   : > { %954 = vmatpush.bf16.xpose.msrb.mxu0 %v864_v37 }
  0x80   : > { %968 = vmatpush.bf16.xpose.msrb.mxu1 %v888_v38 }
  0x81   : > { %982 = vmatpush.bf16.xpose.msrb.mxu2 %v912_v39 }
  0x82   : > { %996 = vmatpush.bf16.xpose.msrb.mxu3 %v936_v40 }
  0x87   : > { %955 = vmatpush.bf16.xpose.msrb.mxu0 %v861_v47 }
  0x88   : > { %969 = vmatpush.bf16.xpose.msrb.mxu1 %v885_v48 }
  0x89   : > { %983 = vmatpush.bf16.xpose.msrb.mxu2 %v909_v49 }
  0x8a   : > { %997 = vmatpush.bf16.xpose.msrb.mxu3 %v933_v50 }
  0x8f   : > { %956 = vmatpush.bf16.xpose.msrb.mxu0 %v858_v56 }
  0x90   : > { %970 = vmatpush.bf16.xpose.msrb.mxu1 %v882_v57 }
  0x91   : > { %984 = vmatpush.bf16.xpose.msrb.mxu2 %v906_v58 }
  0x92   : > { %998 = vmatpush.bf16.xpose.msrb.mxu3 %v930_v59 }
  0x97   : > { %957 = vmatpush.bf16.xpose.msrb.mxu0 %v855_v0 }
  0x98   : > { %971 = vmatpush.bf16.xpose.msrb.mxu1 %v879_v1 }
  0x99   : > { %985 = vmatpush.bf16.xpose.msrb.mxu2 %v903_v2 }
  0x9a   : > { %999 = vmatpush.bf16.xpose.msrb.mxu3 %v927_v3 }
  0x9e   : > { %1436 = vmatmul.msk.bf16.vlgmr.msrb.gmra.mxu0 %vm460_vm0, %v1833_v12 }
  0x9f   : > { %1437 = vmatmul.msk.bf16.vlgmr.msrb.gmra.mxu1 %vm460_vm0, %v1833_v12 }
  0xa0   : > { %1438 = vmatmul.msk.bf16.vlgmr.msrb.gmra.mxu2 %vm460_vm0, %v1833_v12 }
  0xa1   : > { %1439 = vmatmul.msk.bf16.vlgmr.msrb.gmra.mxu3 %vm460_vm0, %v1833_v12 }
  0xbd   : > { %v687_v10 = vpop.permute.xlu0 %686 }
  0xc5   : > { %v692_v17 = vpop.permute.xlu0 %691 }
  0xdb   : > { %v569_v4 = vpop.f32.mrf.mxu0 }
  0xdc   : > { %v583_v5 = vpop.f32.mrf.mxu1 }
  0xe3   : > { %v597_v6 = vpop.f32.mrf.mxu2  ;;  %v571_v8 = vpop.f32.mrf.mxu0 }
  0xe4   : > { %v611_v7 = vpop.f32.mrf.mxu3  ;;  %v585_v9 = vpop.f32.mrf.mxu1 }
  0xeb   : > { %v599_v11 = vpop.f32.mrf.mxu2 }
  0xec   : > { %v613_v13 = vpop.f32.mrf.mxu3 }
 0x11b   : > { %v959_v14 = vpop.f32.mrf.mxu0 }
 0x11c   : > { %v973_v15 = vpop.f32.mrf.mxu1  ;;  %v960_v16 = vadd.f32 %v959_v14, %v687_v10 }
 0x11d   : > { %v974_v18 = vadd.f32 %v973_v15, %v687_v10 }
 0x11e   : > { %1554 = vtanh.f32 %v960_v16 }
 0x11f   : > { %1556 = vtanh.f32 %v974_v18 }
 0x123   : > { %v987_v19 = vpop.f32.mrf.mxu2  ;;  %v961_v21 = vpop.f32.mrf.mxu0 }
 0x124   : > { %v1001_v20 = vpop.f32.mrf.mxu3  ;;  %v975_v22 = vpop.f32.mrf.mxu1  ;;  %v962_v23 = vadd.f32 %v961_v21, %v692_v17  ;;  %v988_v24 = vadd.f32 %v987_v19, %v687_v10 }
 0x125   : > { %v976_v12 = vadd.f32 %v975_v22, %v692_v17  ;;  %v1002_v25 = vadd.f32 %v1001_v20, %v687_v10  ;;  %v1555_v28 = vpop.eup %1554 }
 0x126   : > { %1558 = vtanh.f32 %v962_v23  ;;  %v1557_v31 = vpop.eup %1556  ;;  %v1014_v34 = vmul.f32 %v1555_v28, %v569_v4 }
 0x127   : > { %1560 = vtanh.f32 %v976_v12  ;;  %v1015_v36 = vmul.f32 %v1557_v31, %v583_v5 }
 0x128   : > { %1562 = vtanh.f32 %v988_v24 }
 0x129   : > { %1564 = vtanh.f32 %v1002_v25 }
 0x12b   : > { %v989_v26 = vpop.f32.mrf.mxu2 }
 0x12c   : > { %v1003_v27 = vpop.f32.mrf.mxu3  ;;  %v990_v29 = vadd.f32 %v989_v26, %v692_v17  ;;  %v1559_v32 = vpop.eup %1558 }
 0x12d   : > { %v1004_v30 = vadd.f32 %v1003_v27, %v692_v17  ;;  %v1561_v33 = vpop.eup %1560  ;;  %v1018_v35 = vmul.f32 %v1559_v32, %v571_v8  ;;  %v1064_v8 = vlaneseq }
 0x12e   : > { %1566 = vtanh.f32 %v990_v29  ;;  %v1019_v37 = vmul.f32 %v1561_v33, %v585_v9  ;;  %v1563_v39 = vpop.eup %1562 }
 0x12f   : > { %1568 = vtanh.f32 %v1004_v30  ;;  %v1022_v38 = vadd.f32 %v1018_v35, %v1014_v34  ;;  %v1565_v41 = vpop.eup %1564  ;;  %v1016_v46 = vmul.f32 %v1563_v39, %v597_v6  ;;  %vm1066_vm4 = vcmp.lt.s32.totalorder %v1064_v8, 512 }
 0x130   : > { %v1029_v40 = vadd.f32 %v1019_v37, %v1015_v36  ;;  %v1017_v48 = vmul.f32 %v1565_v41, %v611_v7 }
 0x131   : > { %v1023_v42 = vrot.slane %v1022_v38, 4 }
 0x132   : > { %v1030_v44 = vrot.slane %v1029_v40, 4 }
 0x133   : > { %v1024_v49 = vadd.f32 %v1023_v42, %v1022_v38 }
 0x134   : > { %v1567_v43 = vpop.eup %1566  ;;  %v1031_v50 = vadd.f32 %v1030_v44, %v1029_v40 }
 0x135   : > { %v1569_v45 = vpop.eup %1568  ;;  %v1020_v47 = vmul.f32 %v1567_v43, %v599_v11  ;;  %v1025_v56 = vrot.slane %v1024_v49, 2 }
 0x136   : > { %v1021_v51 = vmul.f32 %v1569_v45, %v613_v13  ;;  %v1032_v53 = vrot.slane %v1031_v50, 2 }
 0x137   : > { %v1036_v52 = vadd.f32 %v1020_v47, %v1016_v46  ;;  %v1026_v63 = vadd.f32 %v1025_v56, %v1024_v49 }
 0x138   : > { %v1043_v54 = vadd.f32 %v1021_v51, %v1017_v48  ;;  %v1033_v57 = vadd.f32 %v1032_v53, %v1031_v50 }
 0x139   : > { %v1037_v55 = vrot.slane %v1036_v52, 4  ;;  %v1027_v5 = vrot.slane %v1026_v63, 1 }
 0x13a   : > { %v1044_v58 = vrot.slane %v1043_v54, 4  ;;  %v1034_v61 = vrot.slane %v1033_v57, 1 }
 0x13b   : > { %v1038_v59 = vadd.f32 %v1037_v55, %v1036_v52  ;;  %v1028_v13 = vadd.f32 %v1027_v5, %v1026_v63 }
 0x13c   : > { %v1045_v60 = vadd.f32 %v1044_v58, %v1043_v54  ;;  %v1035_v3 = vadd.f32 %v1034_v61, %v1033_v57 }
 0x13d   : > { %v1039_v62 = vrot.slane %v1038_v59, 2 }
 0x13e   : > { %v1046_v0 = vrot.slane %v1045_v60, 2  ;;  %v1054_v10 = vrot.slane %v1035_v3, 7 }
 0x13f   : > { %v1040_v1 = vadd.f32 %v1039_v62, %v1038_v59 }
 0x140   : > { %v1047_v2 = vadd.f32 %v1046_v0, %v1045_v60  ;;  %v1058_v15 = vsel %vm1057_vm1, %v1028_v13, %v1054_v10 }
 0x141   : > { %v1041_v4 = vrot.slane %v1040_v1, 1 }
 0x142   : > { %v1048_v6 = vrot.slane %v1047_v2, 1 }
 0x143   : > { %v1042_v7 = vadd.f32 %v1041_v4, %v1040_v1 }
 0x144   : > { %v1049_v9 = vadd.f32 %v1048_v6, %v1047_v2 }
 0x145   : > { %v1055_v11 = vrot.slane %v1042_v7, 6 }
 0x146   : > { %v1056_v14 = vrot.slane %v1049_v9, 5 }
 0x148   : > { %v1060_v16 = vsel %vm1059_vm2, %v1055_v11, %v1056_v14 }
 0x149   : > { %v1062_v17 = vsel %vm1061_vm3, %v1058_v15, %v1060_v16 }
 0x14a   : > { %1068 = vst.msk [vmem:[%s214_s14] sm:$0xf] %vm1066_vm4, %v1062_v17 }
 0x14b   : > { %1609 = shalt.err (!%p1606_p3)
}
 0x14c   : > { %1512 = dma.vmem_to_hbm [thread:$0]  (%p1721_p5), %s1083_s15, 64, %s1085_s0, %s1070_s16  }
 0x14d PF: > { %p1518_p4 = scmp.ge.s32.totalorder %s1646_s25, 2  ;;  %s1096_s29 = sand.u32 1, %s1634_s22  }
 0x14e   : > { %s1097_s8 = scalar_lea.sflag [#allocation5], %s1096_s29 }
 0x14f   : > { %p1515_p7 = pnand %p1518_p4, %p1725_p6 }
 0x151   : > { %p1516_p8 = pneg %p1515_p7 }
 0x153   : > { %1629 = dma.done.wait (%p1516_p8), %s1097_s8, 64  }
 0x154   : > { %1631 = vsyncadd (%p1516_p8), %s1097_s8, 4294967232  ;;  %p23_p9 = scmp.ge.s32.totalorder %s1708_s27, 6   ;;  %s1951_s22 = smov %s1638_s23 }
 0x155   : > { %s1952_s23 = smov %s1642_s24  ;;  %s1953_s24 = smov %s1719_s30 }
 0x156   : > { %s1954_s25 = smov %s1708_s27  ;;  %25 = sbr.rel (!%p23_p9) target bundleno = 9 (0x9), region = 76 }
 0x15b   :  { %1103 = vsyncpa [#allocation5], 1 }
 0x15c   :  { %1105 = vsyncpa [#allocation5 + $0x1], 1 }

</bundles_post_ra>
